<compile_context>
chip_gen: v7x
topology: tpu7x:2x2x1
jax: 0.10.0
libtpu: 0.0.40
codegen_flags: <defaults>
</compile_context>

<pallas_src>
import jax
import jax.numpy as jnp
from jax.experimental import pallas as pl
from jax.experimental.pallas import tpu as pltpu

BN_EPS = 1e-5


def _round_up(x, m):
    return ((x + m - 1) // m) * m


# ---------------------------------------------------------------------------
# Kernel
# ---------------------------------------------------------------------------
def regression_nn_kernel(
    x_ref,                              # (TILE_B, F)   bf16
    w1, b1, w2, b2, w3, b3, w4, b4,     # wi: (in, out) bf16 (BN-folded), bi: (1, out) f32
    w5, b5,                             # w5: (1, 32) f32 row, b5: (1, 1) f32
    out_ref,                            # (TILE_B, 1)   f32
):
    # Layer 1: x already bf16; MXU matmul with f32 accumulation, f32 epilogue on the VPU.
    h = jnp.maximum(
        jnp.dot(x_ref[...], w1[...], preferred_element_type=jnp.float32) + b1[...],
        0.0,
    )
    # Layers 2-4 (unrolled): cast only the dot operand to bf16, keep elementwise in f32
    # (v5e VPU has no bf16; v6e/v7x MXU gets bf16 operands either way).
    for w, b in ((w2, b2), (w3, b3), (w4, b4)):
        acc = jnp.dot(h.astype(jnp.bfloat16), w[...],
                      preferred_element_type=jnp.float32)
        h = jnp.maximum(acc + b[...], 0.0)
    # fc5 (32 -> 1): VPU multiply + lane reduction instead of a 1-output-lane MXU matmul.
    out_ref[...] = jnp.sum(h * w5[...], axis=-1, keepdims=True) + b5[...]


# ---------------------------------------------------------------------------
# Host-side parameter preparation (BN folding + bf16 cast of matmul weights)
# ---------------------------------------------------------------------------
def fold_bn_into_linear(params):
    f = {}
    for i in range(1, 5):
        scale = params[f"g{i}"] * jax.lax.rsqrt(params[f"v{i}"] + BN_EPS)        # (1, n)
        f[f"w{i}"] = (params[f"w{i}"] * scale).astype(jnp.bfloat16)              # (in, n)
        f[f"b{i}"] = (params[f"b{i}"] - params[f"m{i}"]) * scale + params[f"be{i}"]
    f["w5"] = params["w5"].reshape(1, -1).astype(jnp.float32)                    # (1, 32)
    f["b5"] = params["b5"].astype(jnp.float32)                                   # (1, 1)
    return f


def regression_nn_forward(x, params, *, tile_b=1024):
    """x: [B, input_size] float32.  Returns [B, 1] float32."""
    B, F = x.shape
    f = fold_bn_into_linear(params)

    # Batch tile: multiple of 8 (sublane), capped at the (padded) batch.  Big tiles keep
    # the ~0.35us/grid-step overhead amortized; per-tile VMEM is tiny for this model.
    tile_b = min(tile_b, _round_up(B, 8))
    b_pad = _round_up(B, tile_b)
    num_tiles = b_pad // tile_b

    x_bf16 = x.astype(jnp.bfloat16)
    if b_pad != B:
        x_bf16 = jnp.pad(x_bf16, ((0, b_pad - B), (0, 0)))

    weight_args = (f["w1"], f["b1"], f["w2"], f["b2"], f["w3"], f["b3"],
                   f["w4"], f["b4"], f["w5"], f["b5"])

    # Weights/biases: full-array blocks with a constant index map -> fetched once and
    # resident in VMEM across all batch tiles.
    weight_specs = [pl.BlockSpec(a.shape, lambda i: (0, 0)) for a in weight_args]

    out = pl.pallas_call(
        regression_nn_kernel,
        out_shape=jax.ShapeDtypeStruct((b_pad, 1), jnp.float32),
        grid_spec=pltpu.PrefetchScalarGridSpec(
            num_scalar_prefetch=0,
            grid=(num_tiles,),
            in_specs=[pl.BlockSpec((tile_b, F), lambda i: (i, 0))] + weight_specs,
            out_specs=pl.BlockSpec((tile_b, 1), lambda i: (i, 0)),
        ),
        compiler_params=pltpu.CompilerParams(
            dimension_semantics=("parallel",),   # shards batch tiles across 2 TCs on v7x
            vmem_limit_bytes=32 * 1024 * 1024,   # explicit; well under v7x's 64 MiB VMEM
        ),
    )(x_bf16, *weight_args)

    return out[:B]


# ---------------------------------------------------------------------------
# Deterministic params + plain-JAX references
# ---------------------------------------------------------------------------
def init_params(key, input_size):
    sizes = [(input_size, 256), (256, 128), (128, 64), (64, 32), (32, 1)]
    params = {}
    keys = jax.random.split(key, 2 * len(sizes) + 1)
    for i, (fan_in, fan_out) in enumerate(sizes, start=1):
        kw, kb = keys[2 * (i - 1)], keys[2 * (i - 1) + 1]
        params[f"w{i}"] = (jax.random.normal(kw, (fan_in, fan_out), jnp.float32)
                           * (1.0 / jnp.sqrt(fan_in)))
        params[f"b{i}"] = 0.1 * jax.random.normal(kb, (1, fan_out), jnp.float32)
    # BatchNorm1d (eval) params for layers 1..4 — randomized so the BN folding is exercised.
    bn_keys = jax.random.split(keys[-1], 16)
    for j, (i, n) in enumerate(zip(range(1, 5), [256, 128, 64, 32])):
        kg, kb, km, kv = bn_keys[4 * j: 4 * j + 4]
        params[f"g{i}"] = 1.0 + 0.2 * jax.random.normal(kg, (1, n), jnp.float32)
        params[f"be{i}"] = 0.1 * jax.random.normal(kb, (1, n), jnp.float32)
        params[f"m{i}"] = 0.1 * jax.random.normal(km, (1, n), jnp.float32)
        params[f"v{i}"] = jax.random.uniform(kv, (1, n), jnp.float32, 0.5, 1.5)
    return params


def reference_forward_f32(x, p):
    """Full-precision reference matching the PyTorch module (eval, batch>1 branch)."""
    h = x
    for i in range(1, 5):
        h = h @ p[f"w{i}"] + p[f"b{i}"]
        h = (h - p[f"m{i}"]) * (p[f"g{i}"] * jax.lax.rsqrt(p[f"v{i}"] + BN_EPS)) + p[f"be{i}"]
        h = jnp.maximum(h, 0.0)
    return h @ p["w5"] + p["b5"]


def reference_forward_folded(x, p):
    """Plain-JAX reference using the same BN folding + bf16 matmul operands as the kernel."""
    f = fold_bn_into_linear(p)
    h = jnp.maximum(
        jnp.dot(x.astype(jnp.bfloat16), f["w1"], preferred_element_type=jnp.float32)
        + f["b1"], 0.0)
    for i in (2, 3, 4):
        acc = jnp.dot(h.astype(jnp.bfloat16), f[f"w{i}"],
                      preferred_element_type=jnp.float32)
        h = jnp.maximum(acc + f[f"b{i}"], 0.0)
    return jnp.sum(h * f["w5"], axis=-1, keepdims=True) + f["b5"]


if __name__ == "__main__":
    key = jax.random.PRNGKey(0)
    k_x, k_p = jax.random.split(key)

    batch = 8          # > 1, so the BatchNorm branch of forward() is the one modeled
    input_size = 16    # number of scaled features

    x = jax.random.normal(k_x, (batch, input_size), jnp.float32)
    params = init_params(k_p, input_size)

    out = regression_nn_forward(x, params)
    out = jax.block_until_ready(out)
    assert out.shape == (batch, 1), out.shape

    # Tight check vs a plain-JAX reference using the identical folded/bf16 math.
    ref_folded = reference_forward_folded(x, params)
    assert jnp.allclose(out, ref_folded, atol=1e-2, rtol=1e-2), (out, ref_folded)

    # Loose check vs the full-precision (f32) module semantics (bf16 operand error only).
    ref_f32 = reference_forward_f32(x, params)
    assert jnp.allclose(out, ref_f32, atol=1e-1, rtol=1e-1), (out, ref_f32)

    print("KERNEL_OK")
</pallas_src>

<mosaic_0001>
module attributes {stable_mosaic.version = 11 : i64} {
  func.func @regression_nn_kernel(%arg0: i32, %arg1: memref<8x16xbf16, #tpu.memory_space<vmem>>, %arg2: memref<16x256xbf16, #tpu.memory_space<vmem>>, %arg3: memref<1x256xf32, #tpu.memory_space<vmem>>, %arg4: memref<256x128xbf16, #tpu.memory_space<vmem>>, %arg5: memref<1x128xf32, #tpu.memory_space<vmem>>, %arg6: memref<128x64xbf16, #tpu.memory_space<vmem>>, %arg7: memref<1x64xf32, #tpu.memory_space<vmem>>, %arg8: memref<64x32xbf16, #tpu.memory_space<vmem>>, %arg9: memref<1x32xf32, #tpu.memory_space<vmem>>, %arg10: memref<1x32xf32, #tpu.memory_space<vmem>>, %arg11: memref<1x1xf32, #tpu.memory_space<vmem>>, %arg12: memref<8x1xf32, #tpu.memory_space<vmem>>) attributes {dimension_semantics = [#tpu.dimension_semantics<parallel>], iteration_bounds = array<i64: 1>, scalar_prefetch = 0 : i64, scratch_operands = 0 : i64, tpu.core_type = #tpu.core_type<tc>, window_params = [{transform_indices = @transform_0, window_bounds = array<i64: 8, 16>}, {pipeline_mode = #tpu.pipeline_mode<synchronous>, transform_indices = @transform_1, window_bounds = array<i64: 16, 256>}, {pipeline_mode = #tpu.pipeline_mode<synchronous>, transform_indices = @transform_2, window_bounds = array<i64: 1, 256>}, {pipeline_mode = #tpu.pipeline_mode<synchronous>, transform_indices = @transform_3, window_bounds = array<i64: 256, 128>}, {pipeline_mode = #tpu.pipeline_mode<synchronous>, transform_indices = @transform_4, window_bounds = array<i64: 1, 128>}, {pipeline_mode = #tpu.pipeline_mode<synchronous>, transform_indices = @transform_5, window_bounds = array<i64: 128, 64>}, {pipeline_mode = #tpu.pipeline_mode<synchronous>, transform_indices = @transform_6, window_bounds = array<i64: 1, 64>}, {pipeline_mode = #tpu.pipeline_mode<synchronous>, transform_indices = @transform_7, window_bounds = array<i64: 64, 32>}, {pipeline_mode = #tpu.pipeline_mode<synchronous>, transform_indices = @transform_8, window_bounds = array<i64: 1, 32>}, {pipeline_mode = #tpu.pipeline_mode<synchronous>, transform_indices = @transform_9, window_bounds = array<i64: 1, 32>}, {pipeline_mode = #tpu.pipeline_mode<synchronous>, transform_indices = @transform_10, window_bounds = array<i64: 1, 1>}, {transform_indices = @transform_11, window_bounds = array<i64: 8, 1>}]} {
    %c0 = arith.constant 0 : index
    %c0_0 = arith.constant 0 : index
    %0 = vector.load %arg1[%c0, %c0_0] : memref<8x16xbf16, #tpu.memory_space<vmem>>, vector<8x16xbf16>
    %c0_1 = arith.constant 0 : index
    %c0_2 = arith.constant 0 : index
    %1 = vector.load %arg2[%c0_1, %c0_2] : memref<16x256xbf16, #tpu.memory_space<vmem>>, vector<16x256xbf16>
    %cst = arith.constant dense<0.000000e+00> : vector<8x256xf32>
    %2 = tpu.matmul %0, %1, %cst {dimension_numbers = #tpu.dot_dimension_numbers<[1], [0], [0], [1], [0, 0, 1, 1], [], []>} : vector<8x16xbf16>, vector<16x256xbf16>, vector<8x256xf32> -> vector<8x256xf32>
    %c0_3 = arith.constant 0 : index
    %c0_4 = arith.constant 0 : index
    %3 = vector.load %arg3[%c0_3, %c0_4] : memref<1x256xf32, #tpu.memory_space<vmem>>, vector<1x256xf32>
    %4 = vector.broadcast %3 : vector<1x256xf32> to vector<8x256xf32>
    %5 = arith.addf %2, %4 : vector<8x256xf32>
    %cst_5 = arith.constant 0.000000e+00 : f32
    %6 = vector.broadcast %cst_5 : f32 to vector<8x256xf32>
    %7 = arith.maximumf %5, %6 : vector<8x256xf32>
    %8 = arith.truncf %7 : vector<8x256xf32> to vector<8x256xbf16>
    %c0_6 = arith.constant 0 : index
    %c0_7 = arith.constant 0 : index
    %9 = vector.load %arg4[%c0_6, %c0_7] : memref<256x128xbf16, #tpu.memory_space<vmem>>, vector<256x128xbf16>
    %cst_8 = arith.constant dense<0.000000e+00> : vector<8x128xf32>
    %10 = tpu.matmul %8, %9, %cst_8 {dimension_numbers = #tpu.dot_dimension_numbers<[1], [0], [0], [1], [0, 0, 1, 1], [], []>} : vector<8x256xbf16>, vector<256x128xbf16>, vector<8x128xf32> -> vector<8x128xf32>
    %c0_9 = arith.constant 0 : index
    %c0_10 = arith.constant 0 : index
    %11 = vector.load %arg5[%c0_9, %c0_10] : memref<1x128xf32, #tpu.memory_space<vmem>>, vector<1x128xf32>
    %12 = vector.broadcast %11 : vector<1x128xf32> to vector<8x128xf32>
    %13 = arith.addf %10, %12 : vector<8x128xf32>
    %cst_11 = arith.constant 0.000000e+00 : f32
    %14 = vector.broadcast %cst_11 : f32 to vector<8x128xf32>
    %15 = arith.maximumf %13, %14 : vector<8x128xf32>
    %16 = arith.truncf %15 : vector<8x128xf32> to vector<8x128xbf16>
    %c0_12 = arith.constant 0 : index
    %c0_13 = arith.constant 0 : index
    %17 = vector.load %arg6[%c0_12, %c0_13] : memref<128x64xbf16, #tpu.memory_space<vmem>>, vector<128x64xbf16>
    %cst_14 = arith.constant dense<0.000000e+00> : vector<8x64xf32>
    %18 = tpu.matmul %16, %17, %cst_14 {dimension_numbers = #tpu.dot_dimension_numbers<[1], [0], [0], [1], [0, 0, 1, 1], [], []>} : vector<8x128xbf16>, vector<128x64xbf16>, vector<8x64xf32> -> vector<8x64xf32>
    %c0_15 = arith.constant 0 : index
    %c0_16 = arith.constant 0 : index
    %19 = vector.load %arg7[%c0_15, %c0_16] : memref<1x64xf32, #tpu.memory_space<vmem>>, vector<1x64xf32>
    %20 = vector.broadcast %19 : vector<1x64xf32> to vector<8x64xf32>
    %21 = arith.addf %18, %20 : vector<8x64xf32>
    %cst_17 = arith.constant 0.000000e+00 : f32
    %22 = vector.broadcast %cst_17 : f32 to vector<8x64xf32>
    %23 = arith.maximumf %21, %22 : vector<8x64xf32>
    %24 = arith.truncf %23 : vector<8x64xf32> to vector<8x64xbf16>
    %c0_18 = arith.constant 0 : index
    %c0_19 = arith.constant 0 : index
    %25 = vector.load %arg8[%c0_18, %c0_19] : memref<64x32xbf16, #tpu.memory_space<vmem>>, vector<64x32xbf16>
    %cst_20 = arith.constant dense<0.000000e+00> : vector<8x32xf32>
    %26 = tpu.matmul %24, %25, %cst_20 {dimension_numbers = #tpu.dot_dimension_numbers<[1], [0], [0], [1], [0, 0, 1, 1], [], []>} : vector<8x64xbf16>, vector<64x32xbf16>, vector<8x32xf32> -> vector<8x32xf32>
    %c0_21 = arith.constant 0 : index
    %c0_22 = arith.constant 0 : index
    %27 = vector.load %arg9[%c0_21, %c0_22] : memref<1x32xf32, #tpu.memory_space<vmem>>, vector<1x32xf32>
    %28 = vector.broadcast %27 : vector<1x32xf32> to vector<8x32xf32>
    %29 = arith.addf %26, %28 : vector<8x32xf32>
    %cst_23 = arith.constant 0.000000e+00 : f32
    %30 = vector.broadcast %cst_23 : f32 to vector<8x32xf32>
    %31 = arith.maximumf %29, %30 : vector<8x32xf32>
    %c0_24 = arith.constant 0 : index
    %c0_25 = arith.constant 0 : index
    %32 = vector.load %arg10[%c0_24, %c0_25] : memref<1x32xf32, #tpu.memory_space<vmem>>, vector<1x32xf32>
    %33 = vector.broadcast %32 : vector<1x32xf32> to vector<8x32xf32>
    %34 = arith.mulf %31, %33 : vector<8x32xf32>
    %cst_26 = arith.constant dense<0.000000e+00> : vector<8xf32>
    %35 = vector.multi_reduction <add>, %34, %cst_26 [1] : vector<8x32xf32> to vector<8xf32>
    %36 = vector.shape_cast %35 : vector<8xf32> to vector<8x1xf32>
    %c0_27 = arith.constant 0 : index
    %c0_28 = arith.constant 0 : index
    %37 = vector.load %arg11[%c0_27, %c0_28] : memref<1x1xf32, #tpu.memory_space<vmem>>, vector<1x1xf32>
    %38 = vector.broadcast %37 : vector<1x1xf32> to vector<8x1xf32>
    %39 = arith.addf %36, %38 : vector<8x1xf32>
    %c0_29 = arith.constant 0 : index
    %c0_30 = arith.constant 0 : index
    %40 = vector.load %arg12[%c0_29, %c0_30] : memref<8x1xf32, #tpu.memory_space<vmem>>, vector<8x1xf32>
    tpu.vector_store %arg12[%c0_29, %c0_30], %39 {strides = array<i32>} : memref<8x1xf32, #tpu.memory_space<vmem>>, vector<8x1xf32>,
    return
  }
  func.func @transform_0(%arg0: i32) -> (i32, i32) {
    %c0_i32 = arith.constant 0 : i32
    %c0_i32_0 = arith.constant 0 : i32
    return %arg0, %c0_i32 : i32, i32
  }
  func.func @transform_1(%arg0: i32) -> (i32, i32) {
    %c0_i32 = arith.constant 0 : i32
    %c0_i32_0 = arith.constant 0 : i32
    %c0_i32_1 = arith.constant 0 : i32
    return %c0_i32, %c0_i32_0 : i32, i32
  }
  func.func @transform_2(%arg0: i32) -> (i32, i32) {
    %c0_i32 = arith.constant 0 : i32
    %c0_i32_0 = arith.constant 0 : i32
    %c0_i32_1 = arith.constant 0 : i32
    return %c0_i32, %c0_i32_0 : i32, i32
  }
  func.func @transform_3(%arg0: i32) -> (i32, i32) {
    %c0_i32 = arith.constant 0 : i32
    %c0_i32_0 = arith.constant 0 : i32
    %c0_i32_1 = arith.constant 0 : i32
    return %c0_i32, %c0_i32_0 : i32, i32
  }
  func.func @transform_4(%arg0: i32) -> (i32, i32) {
    %c0_i32 = arith.constant 0 : i32
    %c0_i32_0 = arith.constant 0 : i32
    %c0_i32_1 = arith.constant 0 : i32
    return %c0_i32, %c0_i32_0 : i32, i32
  }
  func.func @transform_5(%arg0: i32) -> (i32, i32) {
    %c0_i32 = arith.constant 0 : i32
    %c0_i32_0 = arith.constant 0 : i32
    %c0_i32_1 = arith.constant 0 : i32
    return %c0_i32, %c0_i32_0 : i32, i32
  }
  func.func @transform_6(%arg0: i32) -> (i32, i32) {
    %c0_i32 = arith.constant 0 : i32
    %c0_i32_0 = arith.constant 0 : i32
    %c0_i32_1 = arith.constant 0 : i32
    return %c0_i32, %c0_i32_0 : i32, i32
  }
  func.func @transform_7(%arg0: i32) -> (i32, i32) {
    %c0_i32 = arith.constant 0 : i32
    %c0_i32_0 = arith.constant 0 : i32
    %c0_i32_1 = arith.constant 0 : i32
    return %c0_i32, %c0_i32_0 : i32, i32
  }
  func.func @transform_8(%arg0: i32) -> (i32, i32) {
    %c0_i32 = arith.constant 0 : i32
    %c0_i32_0 = arith.constant 0 : i32
    %c0_i32_1 = arith.constant 0 : i32
    return %c0_i32, %c0_i32_0 : i32, i32
  }
  func.func @transform_9(%arg0: i32) -> (i32, i32) {
    %c0_i32 = arith.constant 0 : i32
    %c0_i32_0 = arith.constant 0 : i32
    %c0_i32_1 = arith.constant 0 : i32
    return %c0_i32, %c0_i32_0 : i32, i32
  }
  func.func @transform_10(%arg0: i32) -> (i32, i32) {
    %c0_i32 = arith.constant 0 : i32
    %c0_i32_0 = arith.constant 0 : i32
    %c0_i32_1 = arith.constant 0 : i32
    return %c0_i32, %c0_i32_0 : i32, i32
  }
  func.func @transform_11(%arg0: i32) -> (i32, i32) {
    %c0_i32 = arith.constant 0 : i32
    %c0_i32_0 = arith.constant 0 : i32
    return %arg0, %c0_i32 : i32, i32
  }
}

</mosaic_0001>

<bundles_post_ra>
// kernel: tpu_custom_call.1
= control target key start
LH: loop header
LB: loop body
LE: loop exit
PB: predicated region body
PF: predicated region fallthrough
CT: control target
= control target key end

     0   :  { %s988_s0 = inlined_call_operand.hbm [shape: bf16[8,16], index: 0, kind: input, shape index: {}]   ;;  %s989_s1 = inlined_call_operand.hbm [shape: bf16[16,256], index: 1, kind: input, shape index: {}]   ;;  %s990_s2 = inlined_call_operand.vmem [shape: f32[1,256], index: 2, kind: input, shape index: {}]   ;;  %s991_s3 = inlined_call_operand.vmem [shape: bf16[256,128], index: 3, kind: input, shape index: {}]   ;;  %s992_s4 = inlined_call_operand.hbm [shape: f32[1,128], index: 4, kind: input, shape index: {}]   ;;  %s993_s5 = inlined_call_operand.vmem [shape: bf16[128,64], index: 5, kind: input, shape index: {}]   ;;  %s994_s6 = inlined_call_operand.vmem [shape: f32[1,64], index: 6, kind: input, shape index: {}]   ;;  %s995_s7 = inlined_call_operand.vmem [shape: bf16[64,32], index: 7, kind: input, shape index: {}]   ;;  %s996_s8 = inlined_call_operand.vmem [shape: f32[1,32], index: 8, kind: input, shape index: {}]   ;;  %s997_s9 = inlined_call_operand.vmem [shape: f32[1,32], index: 9, kind: input, shape index: {}]   ;;  %s998_s10 = inlined_call_operand.<no memory space> [shape: f32[1,1], index: 10, kind: input, shape index: {}]   ;;  %s999_s11 = inlined_call_operand.vmem [shape: f32[8,1], index: 11, kind: output, shape index: {}]  }
   0x1   :  { %v16_v0 = vstv %s998_s10 }
   0x2   :  { %17 = vst [vmem:[#allocation2] sm:$0x1] %v16_v0 }
   0x3   :  { %18 = vsyncpa [#allocation4], 0 }
   0x4   :  { %19 = vsyncpa [#allocation6], 0  ;;  %s768_s19 = smov [#allocation5]   ;;  %s698_s23 = scalar_lea.hbm %s989_s1, 256 }
   0x5   :  { %s35_s20 = sshll.u32 %s768_s19, 4  ;;  %p699_p0 = scmp.ne.s32.totalorder %s989_s1, %s698_s23  ;;  %s36_s20 = int_to_ptr.vmem [resolvable:$true] %s35_s20 }
   0x6   :  { %p702_p1 = scmp.lt.u32.totalorder %s698_s23, %s989_s1 }
   0x8   :  { %p704_p2 = pnand %p702_p1, %p699_p0 }
   0xa   :  { %707 = shalt.err (!%p704_p2)
}
   0xb   :  { %s708_s10 = scalar_lea.vmem %s36_s20, 256  ;;  %p713_p4 = scmp.lt.s32.totalorder %s36_s20, %s36_s20 }
   0xc   :  { %p709_p3 = scmp.ne.s32.totalorder %s36_s20, %s708_s10  ;;  %p714_p5 = scmp.lt.s32.totalorder %s708_s10, %s708_s10 }
   0xe   :  { %p715_p6 = por %p714_p5, %p713_p4 }
  0x10   :  { %p716_p7 = pnand %p715_p6, %p709_p3 }
  0x12   :  { %719 = shalt.err (!%p716_p7)
}
  0x13   :  { %s769_s28 = smov 128   ;;  %s770_s29 = smov 8  }
  0x14   :  { %41 = dma.hbm_to_vmem [thread:$0]  %s989_s1, 256, %s36_s20, [#allocation6], %s769_s28, %s769_s28, %s770_s29  }
  0x15   :  { %s771_s13 = smov [#allocation3]   ;;  %s772_s15 = smov [#allocation7]  }
  0x16   :  { %s26_s14 = sshll.u32 %s771_s13, 4  ;;  %s52_s16 = sshll.u32 %s772_s15, 4  ;;  %s27_s14 = int_to_ptr.vmem [resolvable:$true] %s26_s14  ;;  %s53_s16 = int_to_ptr.vmem [resolvable:$true] %s52_s16 }
  0x17   :  { %s720_s19 = scalar_lea.hbm %s988_s0, 64 }
  0x18   :  { %p721_p8 = scmp.ne.s32.totalorder %s988_s0, %s720_s19  ;;  %p724_p9 = scmp.lt.u32.totalorder %s720_s19, %s988_s0 }
  0x1a   :  { %p726_p10 = pnand %p724_p9, %p721_p8 }
  0x1c   :  { %729 = shalt.err (!%p726_p10)
}
  0x1d   :  { %s730_s1 = scalar_lea.vmem %s27_s14, 64  ;;  %p735_p12 = scmp.lt.s32.totalorder %s27_s14, %s27_s14 }
  0x1e   :  { %p731_p11 = scmp.ne.s32.totalorder %s27_s14, %s730_s1  ;;  %p736_p13 = scmp.lt.s32.totalorder %s730_s1, %s730_s1 }
  0x20   :  { %p737_p0 = por %p736_p13, %p735_p12 }
  0x22   :  { %p738_p1 = pnand %p737_p0, %p731_p11 }
  0x24   :  { %741 = shalt.err (!%p738_p1)
}
  0x25   :  { %29 = dma.hbm_to_vmem [thread:$0]  %s988_s0, 64, %s27_s14, [#allocation4]  }
  0x26   :  { %s742_s10 = scalar_lea.hbm %s992_s4, 16 }
  0x27   :  { %p743_p2 = scmp.ne.s32.totalorder %s992_s4, %s742_s10  ;;  %p746_p3 = scmp.lt.u32.totalorder %s742_s10, %s992_s4 }
  0x29   :  { %p748_p4 = pnand %p746_p3, %p743_p2 }
  0x2b   :  { %751 = shalt.err (!%p748_p4)
}
  0x2c   :  { %s752_s13 = scalar_lea.vmem %s53_s16, 16  ;;  %s756_s15 = scalar_lea.vmem %s53_s16, 32 }
  0x2d   :  { %p753_p5 = scmp.ne.s32.totalorder %s53_s16, %s752_s13  ;;  %p757_p6 = scmp.lt.s32.totalorder %s53_s16, %s53_s16 }
  0x2e   :  { %p758_p7 = scmp.lt.s32.totalorder %s756_s15, %s752_s13 }
  0x30   :  { %p759_p8 = por %p758_p7, %p757_p6 }
  0x32   :  { %p760_p9 = pnand %p759_p8, %p753_p5 }
  0x34   :  { %763 = shalt.err (!%p760_p9)
}
  0x35   :  { %55 = dma.hbm_to_vmem [thread:$0]  %s992_s4, 16, %s53_s16, [#allocation6]  }
  0x36   :  { %764 = dma.done.wait [#allocation4], 64  }
  0x37   :  { %765 = vsyncadd [#allocation4], 4294967232 }
  0x38   :  { %766 = dma.done.wait [#allocation6], 272  }
  0x39   :  { %767 = vsyncadd [#allocation6], 4294967024  ;;  %v773_v1 = vmov 0   ;;  %v667_v2 = vld [vmem:[#allocation5 + $0x4] ss:$8 sps:$4 sm:$0xff]   ;;  %v670_v5 = vld [vmem:[%s991_s3 + $0x40] sm:$0xff]   ;;  %v83_v28 = vlaneseq }
  0x3a   :  { %139 = vmatprep.mubr.bf16.mxu0 %v773_v1  ;;  %v669_v3 = vld [vmem:[#allocation5] ss:$8 sps:$4 sm:$0xff]   ;;  %v78_v4 = vld [vmem:[#allocation3] sm:$0xf]  ;;  %107 = vmatprep.subr.bf16.mxu0 %v667_v2  ;;  %vm103_vm0 = vcmask 130048   ;;  %v676_v11 = vld [vmem:[%s991_s3 + $0x58] sm:$0xff]  }
  0x3b   :  { %108 = vmatpush1.bf16.msra.mxu0 %v669_v3  ;;  %v671_v6 = vld [vmem:[%s991_s3] sm:$0xff]   ;;  %591 = vmatprep.subr.bf16.mxu1 %v670_v5  ;;  %v672_v7 = vld [vmem:[%s991_s3 + $0x48] sm:$0xff]   ;;  %v674_v9 = vld [vmem:[%s991_s3 + $0x50] sm:$0xff]   ;;  %v774_v22 = vmov 0.0   ;;  %v84_v29 = vshrl.u32 %v83_v28, 7  ;;  %vm775_vm1 = vmmov 0  }
  0x3c   :  { %592 = vmatpush3.bf16.msra.mxu1 %v671_v6  ;;  %v673_v8 = vld [vmem:[%s991_s3 + $0x8] sm:$0xff]   ;;  %v675_v10 = vld [vmem:[%s991_s3 + $0x10] sm:$0xff]   ;;  %v677_v12 = vld [vmem:[%s991_s3 + $0x18] sm:$0xff]   ;;  %627 = vmatprep.subr.bf16.mxu0 %v774_v22  ;;  %vm481_vm2 = vcmask 523264   ;;  %vm534_vm3 = vcmask 261120   ;;  %vm546_vm4 = vcmask 7168  }
  0x3d   :  { %593 = vmatprep.subr.bf16.mxu1 %v672_v7  ;;  %v678_v13 = vld [vmem:[%s991_s3 + $0x60] sm:$0xff]   ;;  %v680_v15 = vld [vmem:[%s991_s3 + $0x68] sm:$0xff]   ;;  %v682_v17 = vld [vmem:[%s991_s3 + $0x70] sm:$0xff]   ;;  %v85_v30 = vsub.s32 0, %v84_v29  ;;  %v89_v32 = vsub.s32 1, %v84_v29 }
  0x3e   :  { %556 = vmatmul.mubr.msk.bf16.vlgmr.msra.gmra.mrb[0].mxu0 %vm103_vm0, %v78_v4  ;;  %v679_v14 = vld [vmem:[%s991_s3 + $0x20] sm:$0xff]   ;;  %v681_v16 = vld [vmem:[%s991_s3 + $0x28] sm:$0xff]   ;;  %v683_v18 = vld [vmem:[%s991_s3 + $0x30] sm:$0xff]  }
  0x3f   :  { %v684_v19 = vld [vmem:[%s991_s3 + $0x78] sm:$0xff]   ;;  %v686_v21 = vld [vmem:[%s993_s5] sm:$0xff]   ;;  %v687_v23 = vld [vmem:[%s993_s5 + $0x8] sm:$0xff]   ;;  %643 = vmatprep.mubr.msk.bf16.mxu0 %vm775_vm1, %v774_v22 }
  0x40   :  { %594 = vmatpush3.bf16.msra.mxu1 %v673_v8  ;;  %v685_v20 = vld [vmem:[%s991_s3 + $0x38] sm:$0xff]   ;;  %628 = vmatpush3.bf16.msra.mxu0 %v686_v21  ;;  %v688_v24 = vld [vmem:[%s993_s5 + $0x10] sm:$0xff]   ;;  %v690_v26 = vld [vmem:[%s993_s5 + $0x20] sm:$0xff]  }
  0x41   :  { %595 = vmatprep.subr.bf16.mxu1 %v674_v9  ;;  %629 = vmatprep.subr.bf16.mxu0 %v774_v22  ;;  %v689_v25 = vld [vmem:[%s993_s5 + $0x18] sm:$0xff]   ;;  %v691_v27 = vld [vmem:[%s993_s5 + $0x28] sm:$0xff]   ;;  %v81_v31 = vld [vmem:[%s990_s2] sm:$0x3] }
  0x42   :  { %v86_v33 = vrot.slane %v81_v31, %v85_v30  ;;  %v90_v34 = vrot.slane %v81_v31, %v89_v32  ;;  %v692_v45 = vld [vmem:[%s993_s5 + $0x30] sm:$0xff]   ;;  %v693_v46 = vld [vmem:[%s993_s5 + $0x38] sm:$0xff]   ;;  %v694_v47 = vld [vmem:[%s995_s7] sm:$0xff]  }
  0x43   :  { %v695_v48 = vld [vmem:[%s995_s7 + $0x8] sm:$0xff]   ;;  %v557_v50 = vld [vmem:[#allocation7] ss:$0 sm:$0xff]  ;;  %v697_v59 = vld [vmem:[%s995_s7 + $0x18] sm:$0xff]  }
  0x44   :  { %596 = vmatpush3.bf16.msra.mxu1 %v675_v10  ;;  %630 = vmatpush3.bf16.msra.mxu0 %v687_v23  ;;  %v696_v58 = vld [vmem:[%s995_s7 + $0x10] sm:$0xff]   ;;  %v574_v60 = vld [vmem:[%s994_s6] ss:$0 sm:$0xff] }
  0x45   :  { %597 = vmatprep.subr.bf16.mxu1 %v676_v11  ;;  %631 = vmatprep.subr.bf16.mxu0 %v774_v22  ;;  %v583_v4 = vld [vmem:[%s996_s8] ss:$0 sm:$0xff] }
  0x46   :  { %v589_v9 = vld [vmem:[%s997_s9] ss:$0 sm:$0xff] }
  0x48   :  { %598 = vmatpush3.bf16.msra.mxu1 %v677_v12  ;;  %632 = vmatpush3.bf16.msra.mxu0 %v688_v24 }
  0x49   :  { %599 = vmatprep.subr.bf16.mxu1 %v678_v13  ;;  %633 = vmatprep.subr.bf16.mxu0 %v774_v22 }
  0x4c   :  { %600 = vmatpush3.bf16.msra.mxu1 %v679_v14  ;;  %634 = vmatpush3.bf16.msra.mxu0 %v689_v25  ;;  %v590_v14 = vld [vmem:[#allocation2] ss:$0 sm:$0xff] }
  0x4d   :  { %601 = vmatprep.subr.bf16.mxu1 %v680_v15  ;;  %635 = vmatprep.subr.bf16.mxu0 %v774_v22 }
  0x50   :  { %602 = vmatpush3.bf16.msra.mxu1 %v681_v16  ;;  %636 = vmatpush3.bf16.msra.mxu0 %v690_v26 }
  0x51   :  { %603 = vmatprep.subr.bf16.mxu1 %v682_v17  ;;  %637 = vmatprep.subr.bf16.mxu0 %v774_v22 }
  0x54   :  { %604 = vmatpush3.bf16.msra.mxu1 %v683_v18  ;;  %638 = vmatpush3.bf16.msra.mxu0 %v691_v27 }
  0x55   :  { %605 = vmatprep.subr.bf16.mxu1 %v684_v19  ;;  %639 = vmatprep.subr.bf16.mxu0 %v774_v22 }
  0x58   :  { %606 = vmatpush3.bf16.msra.mxu1 %v685_v20  ;;  %640 = vmatpush3.bf16.msra.mxu0 %v692_v45 }
  0x59   :  { %647 = vmatprep.subr.bf16.mxu1 %v774_v22  ;;  %641 = vmatprep.subr.bf16.mxu0 %v774_v22 }
  0x5c   :  { %642 = vmatpush3.bf16.msra.mxu0 %v693_v46 }
 0x111   :  { %v141_v35 = vpop.f32.mrb[0].mxu0 }
 0x112   :  { %v142_v36 = vadd.f32 %v141_v35, %v86_v33  ;;  %v143_v37 = vpop.f32.mrb[1].mxu0 }
 0x113   :  { %v144_v38 = vadd.f32 %v143_v37, %v90_v34  ;;  %v145_v39 = vpop.f32.mrb[2].mxu0 }
 0x114   :  { %v148_v40 = vmax.f32 %v142_v36, 0.0  ;;  %v146_v41 = vpop.f32.mrb[3].mxu0 }
 0x115   :  { %v149_v42 = vmax.f32 %v144_v38, 0.0 }
 0x116   :  { %v150_v44 = vpack.c.bf16 %v148_v40, %v148_v40 }
 0x117   :  { %v151_v43 = vpack.c.bf16 %v149_v42, %v149_v42 }
 0x119   :  { %319 = vmatprep.mubr.bf16.mxu1 %v151_v43 }
 0x11a   :  { %320 = vmatmul.mubr.bf16.vlgmr.msra.gmra.mrb[0].mxu1 %v150_v44 }
 0x11b   :  { %655 = vmatprep.mubr.msk.bf16.mxu1 %vm775_vm1, %v774_v22  ;;  %648 = vmatpush3.bf16.msra.mxu1 %v694_v47 }
 0x11c   :  { %649 = vmatprep.subr.bf16.mxu1 %v774_v22 }
 0x11f   :  { %650 = vmatpush3.bf16.msra.mxu1 %v695_v48 }
 0x120   :  { %651 = vmatprep.subr.bf16.mxu1 %v774_v22 }
 0x123   :  { %652 = vmatpush3.bf16.msra.mxu1 %v696_v58 }
 0x124   :  { %653 = vmatprep.subr.bf16.mxu1 %v774_v22 }
 0x127   :  { %654 = vmatpush3.bf16.msra.mxu1 %v697_v59 }
 0x1ed   :  { %v607_v49 = vpop.f32.mrb[0].mxu1 }
 0x1ee   :  { %v608_v51 = vpop.f32.mrb[1].mxu1 }
 0x1ef   :  { %v609_v52 = vadd.f32 %v608_v51, %v607_v49  ;;  %v610_v53 = vpop.f32.mrb[2].mxu1 }
 0x1f0   :  { %v611_v54 = vpop.f32.mrb[3].mxu1 }
 0x1f1   :  { %v322_v55 = vadd.f32 %v609_v52, %v557_v50 }
 0x1f3   :  { %v327_v56 = vmax.f32 %v322_v55, 0.0 }
 0x1f5   :  { %v328_v57 = vpack.c.bf16 %v327_v56, %v327_v56 }
 0x1f7   :  { %644 = vmatmul.mubr.bf16.vlgmr.msra.gmra.mrb[4].mxu0 %v328_v57 }
 0x2ca   :  { %v434_v61 = vpop.f32.mrb[4].mxu0 }
 0x2cb   :  { %v435_v62 = vadd.f32 %v574_v60, %v434_v61  ;;  %v645_v63 = vpop.f32.mrb[5].mxu0 }
 0x2cc   :  { %v437_v0 = vpop.f32.mrb[6].mxu0 }
 0x2cd   :  { %v440_v1 = vmax.f32 %v435_v62, 0.0  ;;  %v646_v2 = vpop.f32.mrb[7].mxu0 }
 0x2cf   :  { %v441_v3 = vpack.c.bf16 %v440_v1, %v440_v1 }
 0x2d1   :  { %656 = vmatmul.mubr.msk.bf16.vlgmr.msra.gmra.mrb[4].mxu1 %vm481_vm2, %v441_v3 }
 0x3a4   :  { %v519_v5 = vpop.f32.mrb[4].mxu1 }
 0x3a5   :  { %v520_v6 = vadd.f32 %v583_v4, %v519_v5  ;;  %v657_v7 = vpop.f32.mrb[5].mxu1 }
 0x3a6   :  { %v522_v8 = vpop.f32.mrb[6].mxu1 }
 0x3a7   :  { %v525_v10 = vmax.f32 %v520_v6, 0.0  ;;  %v658_v11 = vpop.f32.mrb[7].mxu1 }
 0x3a9   :  { %v533_v12 = vmul.f32 %v589_v9, %v525_v10 }
 0x3ab   :  { %v535_v13 = vsel %vm534_vm3, %v533_v12, 0.0 }
 0x3ac   :  { %536 = vadd.xlane.f32.xlu0 %v535_v13 }
 0x439   :  { %v537_v15 = vpop.xlane.xlu0 %536 }
 0x43a   :  { %v545_v16 = vadd.f32 %v590_v14, %v537_v15 }
 0x43c   :  { %547 = vst.msk [vmem:[%s999_s11] sm:$0xff] %vm546_vm4, %v545_v16 }
 0x43d   :  { %552 = vsyncpa [#allocation4], 1 }
 0x43e   :  { %553 = vsyncpa [#allocation6], 1 }

</bundles_post_ra>
